<compile_context>
chip_gen: v5e
topology: v5e:2x2
jax: 0.10.0
libtpu: 0.0.40
codegen_flags: <defaults>
</compile_context>

<pallas_src>
import jax
import jax.numpy as jnp
import numpy as np
from jax.experimental import pallas as pl
from jax.experimental.pallas import tpu as pltpu

# small, forward-consistent shapes
B, S, H = 2, 8, 32     # batch, seq, hidden_size
L = 3                  # num_use_layers_as_output
C = 16                 # conv_head_hidden_dim
I = H                  # head_intermediate_dim == head_hidden_dim == hidden_size
HEADS = ("cls", "avg", "max", "attn", "conv", "layers_concat", "layers_avg", "layers_sum")
NH = len(HEADS)

# ---- packed VMEM parameter buffer layout (PM_ROWS x 128 lanes, f32) ----
# rows 0:H  -> fused MXU RHS
COL_C0 = H             # cols 32:48  conv1 tap0
COL_C1 = H + C         # cols 48:64  conv1 tap1
COL_CLS = H + 2 * C    # col 64      w_cls  * ew_cls
COL_AVG = COL_CLS + 1  # col 65      w_avg  * ew_avg / S
COL_ATT = COL_CLS + 2  # col 66      w_attn * ew_attn
# parameter rows (VPU side)
ROW_AB1 = H            # attn first-layer bias          (cols 0:H)
ROW_AW2 = H + 1        # attn second-layer weight (row) (cols 0:H)
ROW_C1B = H + 2        # conv1 bias                     (cols 0:C)
ROW_V0 = H + 3         # conv2 tap 0 (row)              (cols 0:C)
ROW_V1 = H + 4         # conv2 tap 1 (row)              (cols 0:C)
ROW_WMAX = H + 5       # w_max * ew_max (row)           (cols 0:H)
ROW_HC = H + 6         # L combined layers_* rows       (cols 0:H)
PM_ROWS = 48
PM_COLS = 128

# SMEM scalar vector layout (f32[4])
IDX_C2B = 0            # conv2 bias
IDX_EWCONV = 1         # normalized ensemble weight of the conv head
IDX_GBIAS = 2          # sum_h ew_h * bias_h over all Linear heads (incl. layers_concat)
N_SC = 4


def _head_ensemble_kernel(x_ref, hs_ref, pmat_ref, psc_ref, out_ref):
    f32 = jnp.float32
    x = x_ref[...]                                    # [B, S, H]
    hs = hs_ref[...]                                  # [B, L, H]
    x2 = x.reshape(B * S, H)

    # ---- single fused MXU matmul: attn 1st layer + both conv1 taps + cls/avg/attn cols ----
    w = pmat_ref[0:H, :]                              # [H, 128], fully aligned load
    u = jnp.dot(x2, w, preferred_element_type=f32)    # [B*S, 128]
    u3 = u.reshape(B, S, PM_COLS)                     # free sublane split (8-row tiles)

    # ---- attention pooling weights (tanh attention, softmax over seq) ----
    attn_b1 = pmat_ref[ROW_AB1:ROW_AB1 + 1, 0:H]      # [1, H]
    attn_w2 = pmat_ref[ROW_AW2:ROW_AW2 + 1, 0:H]      # [1, H]
    att = jnp.tanh(u[:, 0:H] + attn_b1)               # [B*S, H]
    score = jnp.sum(att * attn_w2, axis=1, keepdims=True).reshape(B, S, 1)
    score = score - jnp.max(score, axis=1, keepdims=True)
    pexp = jnp.exp(score)
    p = pexp * pl.reciprocal(jnp.sum(pexp, axis=1, keepdims=True), approx=True)  # [B,S,1]

    # ---- pooled linear heads from per-token scalar columns (ensemble weights pre-folded) ----
    cls_c = u3[:, 0, COL_CLS:COL_CLS + 1]                          # [B, 1]
    avg_c = jnp.sum(u3[:, :, COL_AVG:COL_AVG + 1], axis=1)         # [B, 1]  (1/S folded)
    attn_c = jnp.sum(p * u3[:, :, COL_ATT:COL_ATT + 1], axis=1)    # [B, 1]

    # ---- max head (non-linear pooling -> VPU multiply + lane reduce) ----
    w_max = pmat_ref[ROW_WMAX:ROW_WMAX + 1, 0:H]                   # [1, H]
    max_c = jnp.sum(jnp.max(x, axis=1) * w_max, axis=1, keepdims=True)   # [B, 1]

    # ---- layers_concat + layers_avg + layers_sum (all folded into HC rows) ----
    hc = pmat_ref[ROW_HC:ROW_HC + L, 0:H]                          # [L, H]
    hs_c = jnp.sum(jnp.sum(hs * hc[None, :, :], axis=2, keepdims=True), axis=1)  # [B, 1]

    # ---- conv head: Conv1d(H->C,k=2,p=1) -> Conv1d(C->1,k=2,p=1) -> relu -> max ----
    c1b = pmat_ref[ROW_C1B:ROW_C1B + 1, 0:C]
    v0 = pmat_ref[ROW_V0:ROW_V0 + 1, 0:C]
    v1 = pmat_ref[ROW_V1:ROW_V1 + 1, 0:C]
    c2b = psc_ref[IDX_C2B]

    y0 = u[:, COL_C0:COL_C0 + C]                       # x @ conv1_tap0   [B*S, C]
    y1 = u[:, COL_C1:COL_C1 + C]                       # x @ conv1_tap1   [B*S, C]
    tpos = jax.lax.broadcasted_iota(jnp.int32, (B * S, 1), 0) % S
    not_first = tpos != 0                              # t==0 rows (also kills roll wrap-around)

    # seq shift via XLU rotate + mask (no scratch, no unaligned stores)
    y0s = jnp.where(not_first, pltpu.roll(y0, shift=1, axis=0), 0.0)   # y0[t-1]
    c1m = y0s + y1 + c1b                               # conv1 output, t = 0..S-1  [B*S, C]
    c1_last = y0.reshape(B, S, C)[:, S - 1, :] + c1b   # conv1 output, t = S       [B, C]

    # conv2 (C -> 1, k=2) on the VPU: multiply by tap rows + lane reduce
    z0 = jnp.sum(c1m * v0, axis=1, keepdims=True)      # [B*S, 1]
    z1 = jnp.sum(c1m * v1, axis=1, keepdims=True)      # [B*S, 1]
    zl0 = jnp.sum(c1_last * v0, axis=1, keepdims=True)  # [B, 1]
    zl1 = jnp.sum(c1_last * v1, axis=1, keepdims=True)  # [B, 1]

    z0s = jnp.where(not_first, pltpu.roll(z0, shift=1, axis=0), 0.0)   # z0[t-1]
    c2m = (z0s + z1 + c2b).reshape(B, S, 1)            # conv2 output, t2 = 0..S-1
    z0_last = z0.reshape(B, S, 1)[:, S - 1, :]         # [B, 1]
    c2_s = z0_last + zl1 + c2b                         # conv2 output, t2 = S
    c2_s1 = zl0 + c2b                                  # conv2 output, t2 = S+1
    conv_feat = jnp.maximum(
        jnp.max(jnp.maximum(c2m, 0.0), axis=1),
        jnp.maximum(jnp.maximum(c2_s, 0.0), jnp.maximum(c2_s1, 0.0)))  # [B, 1]

    # ---- ensemble: all linear-head ensemble weights/biases already folded; only conv left ----
    acc = (cls_c + avg_c + attn_c + max_c + hs_c
           + conv_feat * psc_ref[IDX_EWCONV] + psc_ref[IDX_GBIAS])
    out_ref[...] = acc.reshape(1, B)                   # lane-dense [1, B]


def pack_params(params):
    """Pack the 16 small parameter tensors into one VMEM matrix + one SMEM scalar vector.

    Normalized ensemble weights, 1/S (avg), 1/L (layers_avg), the normalized layer
    weights (layers_sum) and all Linear-head biases are folded in here, host-side.
    """
    (w_heads, b_heads, attn_w1, attn_b1, attn_w2, attn_b2,
     c1w0, c1w1, c1b, c2w0, c2w1, c2b, wcat, bcat, layer_w, ens_w) = params

    ew = ens_w[0] / ens_w[0].sum()    # normalized ensemble weights, HEADS order
    nlw = layer_w[0] / layer_w[0].sum()

    pmat = jnp.zeros((PM_ROWS, PM_COLS), jnp.float32)
    # fused MXU RHS (rows 0:H)
    pmat = pmat.at[0:H, 0:H].set(attn_w1)
    pmat = pmat.at[0:H, COL_C0:COL_C0 + C].set(c1w0)
    pmat = pmat.at[0:H, COL_C1:COL_C1 + C].set(c1w1)
    pmat = pmat.at[0:H, COL_CLS].set(w_heads[:, 0] * ew[0])          # cls
    pmat = pmat.at[0:H, COL_AVG].set(w_heads[:, 1] * (ew[1] / S))    # avg (mean folded)
    pmat = pmat.at[0:H, COL_ATT].set(w_heads[:, 3] * ew[3])          # attn
    # VPU parameter rows
    pmat = pmat.at[ROW_AB1, 0:H].set(attn_b1[0])
    pmat = pmat.at[ROW_AW2, 0:H].set(attn_w2[:, 0])
    pmat = pmat.at[ROW_C1B, 0:C].set(c1b[0])
    pmat = pmat.at[ROW_V0, 0:C].set(c2w0[:, 0])
    pmat = pmat.at[ROW_V1, 0:C].set(c2w1[:, 0])
    pmat = pmat.at[ROW_WMAX, 0:H].set(w_heads[:, 2] * ew[2])         # max
    # combined layers_* rows: layers_concat + layers_avg + layers_sum folded per layer l
    for l in range(L):
        hc_l = (wcat[l * H:(l + 1) * H, 0] * ew[5]
                + w_heads[:, 4] * (ew[6] / L)
                + w_heads[:, 5] * (ew[7] * nlw[l]))
        pmat = pmat.at[ROW_HC + l, 0:H].set(hc_l)

    # single folded bias over all Linear heads (conv head has no output Linear)
    gbias = (ew[0] * b_heads[0, 0] + ew[1] * b_heads[0, 1] + ew[2] * b_heads[0, 2]
             + ew[3] * b_heads[0, 3] + ew[5] * bcat[0, 0]
             + ew[6] * b_heads[0, 4] + ew[7] * b_heads[0, 5])
    # NOTE: attn_b2 is intentionally dropped (softmax is shift-invariant).
    psc = jnp.stack([c2b[0, 0], ew[4], gbias,
                     jnp.zeros((), jnp.float32)]).astype(jnp.float32)
    return pmat, psc


def head_ensemble_forward(x, hs_cls, pmat, psc):
    vmem = pl.BlockSpec(memory_space=pltpu.MemorySpace.VMEM)
    smem = pl.BlockSpec(memory_space=pltpu.MemorySpace.SMEM)
    out = pl.pallas_call(
        _head_ensemble_kernel,
        out_shape=jax.ShapeDtypeStruct((1, B), jnp.float32),
        in_specs=[vmem, vmem, vmem, smem],
        out_specs=vmem,
    )(x, hs_cls, pmat, psc)
    return out.reshape(B)   # matches outputs.reshape(input_ids.shape[0])


def reference_forward(x, hs, params):
    (w_heads, b_heads, attn_w1, attn_b1, attn_w2, attn_b2,
     c1w0, c1w1, c1b, c2w0, c2w1, c2b, wcat, bcat, layer_w, ens_w) = params

    def lin(f, col):
        return f @ w_heads[:, col] + b_heads[0, col]

    feats = []
    feats.append(lin(x[:, 0, :], 0))
    feats.append(lin(x.mean(1), 1))
    feats.append(lin(x.max(1), 2))
    att = jnp.tanh(x @ attn_w1 + attn_b1[0])
    score = (att @ attn_w2)[..., 0] + attn_b2[0, 0]
    p = jax.nn.softmax(score, axis=1)
    feats.append(lin((p[..., None] * x).sum(1), 3))
    xp = jnp.pad(x, ((0, 0), (1, 1), (0, 0)))
    c1 = xp[:, :-1, :] @ c1w0 + xp[:, 1:, :] @ c1w1 + c1b[0]
    c1p = jnp.pad(c1, ((0, 0), (1, 1), (0, 0)))
    c2 = (c1p[:, :-1, :] @ c2w0 + c1p[:, 1:, :] @ c2w1)[..., 0] + c2b[0, 0]
    feats.append(jnp.max(jax.nn.relu(c2), axis=1))
    cat = hs.reshape(B, L * H)
    feats.append(cat @ wcat[:, 0] + bcat[0, 0])
    feats.append(lin(hs.mean(1), 4))
    lw = layer_w[0] / layer_w[0].sum()
    feats.append(lin((hs * lw[None, :, None]).sum(1), 5))
    F = jnp.stack(feats, axis=-1)                 # [B, NH]
    ew = ens_w[0] / ens_w[0].sum()
    return (F * ew[None, :]).sum(-1)


def make_params(key):
    ks = jax.random.split(key, 14)
    std = 0.02  # initializer_range for output layers (see _init_weight)
    w_heads = std * jax.random.normal(ks[0], (H, 6), jnp.float32)
    # non-zero biases used here to exercise the folded-bias path (forward supports any values)
    b_heads = std * jax.random.normal(ks[12], (1, 6), jnp.float32)
    attn_w1 = 0.05 * jax.random.normal(ks[1], (H, I), jnp.float32)
    attn_b1 = 0.05 * jax.random.normal(ks[2], (1, I), jnp.float32)
    attn_w2 = 0.05 * jax.random.normal(ks[3], (I, 1), jnp.float32)
    attn_b2 = 0.05 * jax.random.normal(ks[4], (1, 1), jnp.float32)
    c1w0 = 0.05 * jax.random.normal(ks[5], (H, C), jnp.float32)
    c1w1 = 0.05 * jax.random.normal(ks[6], (H, C), jnp.float32)
    c1b = 0.05 * jax.random.normal(ks[7], (1, C), jnp.float32)
    c2w0 = 0.05 * jax.random.normal(ks[8], (C, 1), jnp.float32)
    c2w1 = 0.05 * jax.random.normal(ks[9], (C, 1), jnp.float32)
    c2b = 0.05 * jax.random.normal(ks[10], (1, 1), jnp.float32)
    wcat = std * jax.random.normal(ks[11], (L * H, 1), jnp.float32)
    bcat = std * jax.random.normal(ks[13], (1, 1), jnp.float32)
    layer_w = jnp.ones((1, L), jnp.float32)     # nn.Parameter(torch.tensor([1]*L))
    ens_w = jnp.ones((1, NH), jnp.float32)      # init.constant_(ensemble_weight, 1.0)
    return (w_heads, b_heads, attn_w1, attn_b1, attn_w2, attn_b2,
            c1w0, c1w1, c1b, c2w0, c2w1, c2b, wcat, bcat, layer_w, ens_w)


if __name__ == "__main__":
    key = jax.random.PRNGKey(0)
    kx, kh, kp = jax.random.split(key, 3)
    x = jax.random.normal(kx, (B, S, H), jnp.float32)        # last_hidden_state
    hs_cls = jax.random.normal(kh, (B, L, H), jnp.float32)   # CLS of last L hidden_states
    params = make_params(kp)
    pmat, psc = pack_params(params)                          # packed once, host-side

    out = head_ensemble_forward(x, hs_cls, pmat, psc)
    out = jax.block_until_ready(out)

    ref = reference_forward(x, hs_cls, params)
    np.testing.assert_allclose(np.asarray(out), np.asarray(ref), rtol=2e-3, atol=2e-3)
    assert out.shape == (B,)
    print("KERNEL_OK")
</pallas_src>

<mosaic_0001>
module attributes {stable_mosaic.version = 11 : i64} {
  func.func @_head_ensemble_kernel(%arg0: memref<2x8x32xf32, #tpu.memory_space<vmem>>, %arg1: memref<2x3x32xf32, #tpu.memory_space<vmem>>, %arg2: memref<48x128xf32, #tpu.memory_space<vmem>>, %arg3: memref<4xf32, #tpu.memory_space<smem>>, %arg4: memref<1x2xf32, #tpu.memory_space<vmem>>) attributes {dimension_semantics = [], scalar_prefetch = 0 : i64, scratch_operands = 0 : i64, tpu.core_type = #tpu.core_type<tc>} {
    %c0 = arith.constant 0 : index
    %c0_0 = arith.constant 0 : index
    %c0_1 = arith.constant 0 : index
    %0 = vector.load %arg0[%c0, %c0_0, %c0_1] : memref<2x8x32xf32, #tpu.memory_space<vmem>>, vector<2x8x32xf32>
    %c0_2 = arith.constant 0 : index
    %c0_3 = arith.constant 0 : index
    %c0_4 = arith.constant 0 : index
    %1 = vector.load %arg1[%c0_2, %c0_3, %c0_4] : memref<2x3x32xf32, #tpu.memory_space<vmem>>, vector<2x3x32xf32>
    %2 = vector.shape_cast %0 : vector<2x8x32xf32> to vector<16x32xf32>
    %c0_5 = arith.constant 0 : index
    %c0_6 = arith.constant 0 : index
    %3 = vector.load %arg2[%c0_5, %c0_6] : memref<48x128xf32, #tpu.memory_space<vmem>>, vector<32x128xf32>
    %cst = arith.constant dense<0.000000e+00> : vector<16x128xf32>
    %4 = tpu.matmul %2, %3, %cst {dimension_numbers = #tpu.dot_dimension_numbers<[1], [0], [0], [1], [0, 0, 1, 1], [], []>} : vector<16x32xf32>, vector<32x128xf32>, vector<16x128xf32> -> vector<16x128xf32>
    %5 = vector.shape_cast %4 : vector<16x128xf32> to vector<2x8x128xf32>
    %c32 = arith.constant 32 : index
    %c0_7 = arith.constant 0 : index
    %6 = vector.load %arg2[%c32, %c0_7] : memref<48x128xf32, #tpu.memory_space<vmem>>, vector<1x32xf32>
    %c33 = arith.constant 33 : index
    %c0_8 = arith.constant 0 : index
    %7 = vector.load %arg2[%c33, %c0_8] : memref<48x128xf32, #tpu.memory_space<vmem>>, vector<1x32xf32>
    %8 = vector.extract_strided_slice %4 {offsets = [0, 0], sizes = [16, 32], strides = [1, 1]} : vector<16x128xf32> to vector<16x32xf32>
    %9 = vector.broadcast %6 : vector<1x32xf32> to vector<16x32xf32>
    %10 = arith.addf %8, %9 : vector<16x32xf32>
    %11 = math.tanh %10 : vector<16x32xf32>
    %12 = vector.broadcast %7 : vector<1x32xf32> to vector<16x32xf32>
    %13 = arith.mulf %11, %12 : vector<16x32xf32>
    %cst_9 = arith.constant dense<0.000000e+00> : vector<16xf32>
    %14 = vector.multi_reduction <add>, %13, %cst_9 [1] : vector<16x32xf32> to vector<16xf32>
    %15 = vector.shape_cast %14 : vector<16xf32> to vector<16x1xf32>
    %16 = vector.shape_cast %15 : vector<16x1xf32> to vector<2x8x1xf32>
    %cst_10 = arith.constant dense<0xFF800000> : vector<2x1xf32>
    %17 = vector.multi_reduction <maximumf>, %16, %cst_10 [1] : vector<2x8x1xf32> to vector<2x1xf32>
    %18 = vector.shape_cast %17 : vector<2x1xf32> to vector<2x1x1xf32>
    %19 = vector.broadcast %18 : vector<2x1x1xf32> to vector<2x8x1xf32>
    %20 = arith.subf %16, %19 : vector<2x8x1xf32>
    %21 = math.exp %20 : vector<2x8x1xf32>
    %cst_11 = arith.constant dense<0.000000e+00> : vector<2x1xf32>
    %22 = vector.multi_reduction <add>, %21, %cst_11 [1] : vector<2x8x1xf32> to vector<2x1xf32>
    %23 = vector.shape_cast %22 : vector<2x1xf32> to vector<2x1x1xf32>
    %24 = tpu.reciprocal %23 {approx = true} : vector<2x1x1xf32> -> vector<2x1x1xf32>
    %25 = vector.broadcast %24 : vector<2x1x1xf32> to vector<2x8x1xf32>
    %26 = arith.mulf %21, %25 : vector<2x8x1xf32>
    %27 = vector.extract_strided_slice %5 {offsets = [0, 0, 64], sizes = [2, 1, 1], strides = [1, 1, 1]} : vector<2x8x128xf32> to vector<2x1x1xf32>
    %28 = vector.shape_cast %27 : vector<2x1x1xf32> to vector<2x1xf32>
    %29 = vector.extract_strided_slice %5 {offsets = [0, 0, 65], sizes = [2, 8, 1], strides = [1, 1, 1]} : vector<2x8x128xf32> to vector<2x8x1xf32>
    %cst_12 = arith.constant dense<0.000000e+00> : vector<2x1xf32>
    %30 = vector.multi_reduction <add>, %29, %cst_12 [1] : vector<2x8x1xf32> to vector<2x1xf32>
    %31 = vector.extract_strided_slice %5 {offsets = [0, 0, 66], sizes = [2, 8, 1], strides = [1, 1, 1]} : vector<2x8x128xf32> to vector<2x8x1xf32>
    %32 = arith.mulf %26, %31 : vector<2x8x1xf32>
    %cst_13 = arith.constant dense<0.000000e+00> : vector<2x1xf32>
    %33 = vector.multi_reduction <add>, %32, %cst_13 [1] : vector<2x8x1xf32> to vector<2x1xf32>
    %c37 = arith.constant 37 : index
    %c0_14 = arith.constant 0 : index
    %34 = vector.load %arg2[%c37, %c0_14] : memref<48x128xf32, #tpu.memory_space<vmem>>, vector<1x32xf32>
    %cst_15 = arith.constant dense<0xFF800000> : vector<2x32xf32>
    %35 = vector.multi_reduction <maximumf>, %0, %cst_15 [1] : vector<2x8x32xf32> to vector<2x32xf32>
    %36 = vector.broadcast %34 : vector<1x32xf32> to vector<2x32xf32>
    %37 = arith.mulf %35, %36 : vector<2x32xf32>
    %cst_16 = arith.constant dense<0.000000e+00> : vector<2xf32>
    %38 = vector.multi_reduction <add>, %37, %cst_16 [1] : vector<2x32xf32> to vector<2xf32>
    %39 = vector.shape_cast %38 : vector<2xf32> to vector<2x1xf32>
    %c38 = arith.constant 38 : index
    %c0_17 = arith.constant 0 : index
    %40 = vector.load %arg2[%c38, %c0_17] : memref<48x128xf32, #tpu.memory_space<vmem>>, vector<3x32xf32>
    %41 = vector.shape_cast %40 : vector<3x32xf32> to vector<1x3x32xf32>
    %42 = vector.broadcast %41 : vector<1x3x32xf32> to vector<2x3x32xf32>
    %43 = arith.mulf %1, %42 : vector<2x3x32xf32>
    %cst_18 = arith.constant dense<0.000000e+00> : vector<2x3xf32>
    %44 = vector.multi_reduction <add>, %43, %cst_18 [2] : vector<2x3x32xf32> to vector<2x3xf32>
    %45 = vector.shape_cast %44 : vector<2x3xf32> to vector<2x3x1xf32>
    %cst_19 = arith.constant dense<0.000000e+00> : vector<2x1xf32>
    %46 = vector.multi_reduction <add>, %45, %cst_19 [1] : vector<2x3x1xf32> to vector<2x1xf32>
    %c34 = arith.constant 34 : index
    %c0_20 = arith.constant 0 : index
    %47 = vector.load %arg2[%c34, %c0_20] : memref<48x128xf32, #tpu.memory_space<vmem>>, vector<1x16xf32>
    %c35 = arith.constant 35 : index
    %c0_21 = arith.constant 0 : index
    %48 = vector.load %arg2[%c35, %c0_21] : memref<48x128xf32, #tpu.memory_space<vmem>>, vector<1x16xf32>
    %c36 = arith.constant 36 : index
    %c0_22 = arith.constant 0 : index
    %49 = vector.load %arg2[%c36, %c0_22] : memref<48x128xf32, #tpu.memory_space<vmem>>, vector<1x16xf32>
    %c0_23 = arith.constant 0 : index
    %50 = memref.load %arg3[%c0_23] : memref<4xf32, #tpu.memory_space<smem>>
    %51 = vector.extract_strided_slice %4 {offsets = [0, 32], sizes = [16, 16], strides = [1, 1]} : vector<16x128xf32> to vector<16x16xf32>
    %52 = vector.extract_strided_slice %4 {offsets = [0, 48], sizes = [16, 16], strides = [1, 1]} : vector<16x128xf32> to vector<16x16xf32>
    %53 = tpu.iota {dimensions = array<i32: 0>} : vector<16x1xi32>
    %c8_i32 = arith.constant 8 : i32
    %c0_i32 = arith.constant 0 : i32
    %54 = arith.cmpi eq, %c8_i32, %c0_i32 : i32
    %c1_i32 = arith.constant 1 : i32
    %55 = arith.select %54, %c1_i32, %c8_i32 : i32
    %56 = vector.broadcast %55 : i32 to vector<16x1xi32>
    %57 = arith.remsi %53, %56 : vector<16x1xi32>
    %c0_i32_24 = arith.constant 0 : i32
    %58 = vector.broadcast %c0_i32_24 : i32 to vector<16x1xi32>
    %59 = arith.cmpi ne, %57, %58 : vector<16x1xi32>
    %c0_i32_25 = arith.constant 0 : i32
    %60 = vector.broadcast %c0_i32_25 : i32 to vector<16x1xi32>
    %61 = arith.cmpi slt, %57, %60 : vector<16x1xi32>
    %c0_i32_26 = arith.constant 0 : i32
    %62 = arith.cmpi slt, %55, %c0_i32_26 : i32
    %63 = vector.broadcast %62 : i1 to vector<16x1xi1>
    %64 = vector.broadcast %63 : vector<16x1xi1> to vector<16x1xi1>
    %65 = arith.xori %61, %64 : vector<16x1xi1>
    %66 = arith.andi %65, %59 : vector<16x1xi1>
    %67 = vector.broadcast %55 : i32 to vector<16x1xi32>
    %68 = arith.addi %57, %67 : vector<16x1xi32>
    %69 = arith.select %66, %68, %57 : vector<16x1xi1>, vector<16x1xi32>
    %c0_i32_27 = arith.constant 0 : i32
    %70 = vector.broadcast %c0_i32_27 : i32 to vector<16x1xi32>
    %71 = arith.cmpi ne, %69, %70 : vector<16x1xi32>
    %c1_i32_28 = arith.constant 1 : i32
    %72 = tpu.dynamic_rotate %51 by %c1_i32_28 dim 0 : vector<16x16xf32>, i32 -> vector<16x16xf32>
    %cst_29 = arith.constant 0.000000e+00 : f32
    %73 = vector.shape_cast %71 : vector<16x1xi1> to vector<16x1xi1>
    %74 = vector.broadcast %73 : vector<16x1xi1> to vector<16x16xi1>
    %75 = vector.broadcast %cst_29 : f32 to vector<16x16xf32>
    %76 = arith.select %74, %72, %75 : vector<16x16xi1>, vector<16x16xf32>
    %77 = arith.addf %76, %52 : vector<16x16xf32>
    %78 = vector.broadcast %47 : vector<1x16xf32> to vector<16x16xf32>
    %79 = arith.addf %77, %78 : vector<16x16xf32>
    %80 = vector.shape_cast %51 : vector<16x16xf32> to vector<2x8x16xf32>
    %81 = vector.extract_strided_slice %80 {offsets = [0, 7, 0], sizes = [2, 1, 16], strides = [1, 1, 1]} : vector<2x8x16xf32> to vector<2x1x16xf32>
    %82 = vector.shape_cast %81 : vector<2x1x16xf32> to vector<2x16xf32>
    %83 = vector.broadcast %47 : vector<1x16xf32> to vector<2x16xf32>
    %84 = arith.addf %82, %83 : vector<2x16xf32>
    %85 = vector.broadcast %48 : vector<1x16xf32> to vector<16x16xf32>
    %86 = arith.mulf %79, %85 : vector<16x16xf32>
    %cst_30 = arith.constant dense<0.000000e+00> : vector<16xf32>
    %87 = vector.multi_reduction <add>, %86, %cst_30 [1] : vector<16x16xf32> to vector<16xf32>
    %88 = vector.shape_cast %87 : vector<16xf32> to vector<16x1xf32>
    %89 = vector.broadcast %49 : vector<1x16xf32> to vector<16x16xf32>
    %90 = arith.mulf %79, %89 : vector<16x16xf32>
    %cst_31 = arith.constant dense<0.000000e+00> : vector<16xf32>
    %91 = vector.multi_reduction <add>, %90, %cst_31 [1] : vector<16x16xf32> to vector<16xf32>
    %92 = vector.shape_cast %91 : vector<16xf32> to vector<16x1xf32>
    %93 = vector.broadcast %48 : vector<1x16xf32> to vector<2x16xf32>
    %94 = arith.mulf %84, %93 : vector<2x16xf32>
    %cst_32 = arith.constant dense<0.000000e+00> : vector<2xf32>
    %95 = vector.multi_reduction <add>, %94, %cst_32 [1] : vector<2x16xf32> to vector<2xf32>
    %96 = vector.shape_cast %95 : vector<2xf32> to vector<2x1xf32>
    %97 = vector.broadcast %49 : vector<1x16xf32> to vector<2x16xf32>
    %98 = arith.mulf %84, %97 : vector<2x16xf32>
    %cst_33 = arith.constant dense<0.000000e+00> : vector<2xf32>
    %99 = vector.multi_reduction <add>, %98, %cst_33 [1] : vector<2x16xf32> to vector<2xf32>
    %100 = vector.shape_cast %99 : vector<2xf32> to vector<2x1xf32>
    %c1_i32_34 = arith.constant 1 : i32
    %101 = tpu.dynamic_rotate %88 by %c1_i32_34 dim 0 : vector<16x1xf32>, i32 -> vector<16x1xf32>
    %cst_35 = arith.constant 0.000000e+00 : f32
    %102 = vector.broadcast %cst_35 : f32 to vector<16x1xf32>
    %103 = arith.select %71, %101, %102 : vector<16x1xi1>, vector<16x1xf32>
    %104 = arith.addf %103, %92 : vector<16x1xf32>
    %105 = vector.broadcast %50 : f32 to vector<16x1xf32>
    %106 = arith.addf %104, %105 : vector<16x1xf32>
    %107 = vector.shape_cast %106 : vector<16x1xf32> to vector<2x8x1xf32>
    %108 = vector.shape_cast %88 : vector<16x1xf32> to vector<2x8x1xf32>
    %109 = vector.extract_strided_slice %108 {offsets = [0, 7, 0], sizes = [2, 1, 1], strides = [1, 1, 1]} : vector<2x8x1xf32> to vector<2x1x1xf32>
    %110 = vector.shape_cast %109 : vector<2x1x1xf32> to vector<2x1xf32>
    %111 = arith.addf %110, %100 : vector<2x1xf32>
    %112 = vector.broadcast %50 : f32 to vector<2x1xf32>
    %113 = arith.addf %111, %112 : vector<2x1xf32>
    %114 = vector.broadcast %50 : f32 to vector<2x1xf32>
    %115 = arith.addf %96, %114 : vector<2x1xf32>
    %cst_36 = arith.constant 0.000000e+00 : f32
    %116 = vector.broadcast %cst_36 : f32 to vector<2x8x1xf32>
    %117 = arith.maximumf %107, %116 : vector<2x8x1xf32>
    %cst_37 = arith.constant dense<0xFF800000> : vector<2x1xf32>
    %118 = vector.multi_reduction <maximumf>, %117, %cst_37 [1] : vector<2x8x1xf32> to vector<2x1xf32>
    %cst_38 = arith.constant 0.000000e+00 : f32
    %119 = vector.broadcast %cst_38 : f32 to vector<2x1xf32>
    %120 = arith.maximumf %113, %119 : vector<2x1xf32>
    %cst_39 = arith.constant 0.000000e+00 : f32
    %121 = vector.broadcast %cst_39 : f32 to vector<2x1xf32>
    %122 = arith.maximumf %115, %121 : vector<2x1xf32>
    %123 = arith.maximumf %120, %122 : vector<2x1xf32>
    %124 = arith.maximumf %118, %123 : vector<2x1xf32>
    %125 = arith.addf %28, %30 : vector<2x1xf32>
    %126 = arith.addf %125, %33 : vector<2x1xf32>
    %127 = arith.addf %126, %39 : vector<2x1xf32>
    %128 = arith.addf %127, %46 : vector<2x1xf32>
    %c1 = arith.constant 1 : index
    %129 = memref.load %arg3[%c1] : memref<4xf32, #tpu.memory_space<smem>>
    %130 = vector.broadcast %129 : f32 to vector<2x1xf32>
    %131 = arith.mulf %124, %130 : vector<2x1xf32>
    %132 = arith.addf %128, %131 : vector<2x1xf32>
    %c2 = arith.constant 2 : index
    %133 = memref.load %arg3[%c2] : memref<4xf32, #tpu.memory_space<smem>>
    %134 = vector.broadcast %133 : f32 to vector<2x1xf32>
    %135 = arith.addf %132, %134 : vector<2x1xf32>
    %136 = vector.shape_cast %135 : vector<2x1xf32> to vector<1x2xf32>
    %c0_40 = arith.constant 0 : index
    %c0_41 = arith.constant 0 : index
    %137 = vector.load %arg4[%c0_40, %c0_41] : memref<1x2xf32, #tpu.memory_space<vmem>>, vector<1x2xf32>
    tpu.vector_store %arg4[%c0_40, %c0_41], %136 {strides = array<i32>} : memref<1x2xf32, #tpu.memory_space<vmem>>, vector<1x2xf32>,
    return
  }
}

</mosaic_0001>

<bundles_post_ra>
// kernel: tpu_custom_call.1
= control target key start
LH: loop header
LB: loop body
LE: loop exit
PB: predicated region body
PF: predicated region fallthrough
CT: control target
= control target key end

     0   :  { %9 = vsyncpa [#allocation3], 0  ;;  %s787_s0 = inlined_call_operand.hbm [shape: f32[2,8,32], index: 0, kind: input, shape index: {}]   ;;  %s788_s1 = inlined_call_operand.vmem [shape: f32[2,3,32], index: 1, kind: input, shape index: {}]   ;;  %s789_s2 = inlined_call_operand.hbm [shape: f32[48,128], index: 2, kind: input, shape index: {}]   ;;  %s790_s3 = inlined_call_operand.vmem [shape: f32[4], index: 3, kind: input, shape index: {}]   ;;  %s791_s4 = inlined_call_operand.hbm [shape: f32[1,2], index: 4, kind: output, shape index: {}]  }
   0x1   :  { %10 = vsyncpa [#allocation7], 0 }
   0x2   :  { %11 = vsyncpa [#allocation5], 0 }
   0x3   :  { %12 = vsyncpa [#allocation4], 0  ;;  %s17_s17 = sshll.u32 %s787_s0, 4  ;;  %s632_s18 = smov [#allocation2]   ;;  %s18_s17 = int_to_ptr.hbm [resolvable:$true] %s17_s17 }
   0x4   :  { %s19_s19 = sshll.u32 %s632_s18, 4  ;;  %s32_s22 = sshll.u32 %s789_s2, 4  ;;  %s20_s19 = int_to_ptr.vmem [resolvable:$true] %s19_s19  ;;  %s33_s22 = int_to_ptr.hbm [resolvable:$true] %s32_s22 }
   0x5   :  { %s633_s23 = smov 128   ;;  %s634_s24 = smov 8  }
   0x6   :  { %25 = dma.hbm_to_vmem [thread:$0]  %s18_s17, 256, %s20_s19, [#allocation3], %s633_s23, %s633_s23, %s634_s24  }
   0x7   :  { %s635_s25 = smov [#allocation6]   ;;  %s46_s29 = sshll.u32 %s790_s3, 4  ;;  %s47_s29 = int_to_ptr.vmem [resolvable:$true] %s46_s29 }
   0x8   :  { %s34_s26 = sshll.u32 %s635_s25, 4  ;;  %s636_s0 = smov [#allocation8]   ;;  %s35_s26 = int_to_ptr.vmem [resolvable:$true] %s34_s26 }
   0x9   :  { %40 = dma.hbm_to_vmem [thread:$0]  %s33_s22, 768, %s35_s26, [#allocation7], %s633_s23, %s633_s23, %s634_s24  }
   0xa   :  { %49 = dma.vmem_to_smem %s47_s29, 16, %s636_s0, [#allocation5]  }
   0xb   :  { %624 = dma.done.wait [#allocation3], 256  }
   0xc   :  { %625 = vsyncadd [#allocation3], 4294967040 }
   0xd   :  { %626 = dma.done.wait [#allocation7], 768  }
   0xe   :  { %627 = vsyncadd [#allocation7], 4294966528 }
   0xf   :  { %628 = dma.done.wait [#allocation5], 16  }
  0x10   :  { %629 = vsyncadd [#allocation5], 4294967280 }
  0x11   :  { %62 = sfence }
  0x12   :  { %v70_v0 = vld [vmem:[#allocation6 + $0x18] sm:$0xff]  ;;  %v69_v1 = vld [vmem:[#allocation6 + $0x10] sm:$0xff]  ;;  %v68_v2 = vld [vmem:[#allocation6 + $0x8] sm:$0xff]  ;;  %s637_s2 = smov 32   ;;  %vm71_vm0 = vcmask 261120   ;;  %s638_s3 = smov 80   ;;  %v240_v32 = vlaneseq }
  0x13   :  { %90 = vmatpush.msra.mxu0 %v70_v0  ;;  %504 = vmatpush.msra.mxu1 %v70_v0  ;;  %v679_v3 = vld [vmem:[#allocation6 + $0x22] ss:$0 sm:$0xff]  ;;  %v681_v5 = vld [vmem:[#allocation6 + $0x23] ss:$0 sm:$0xff]  ;;  %v683_v6 = vld [vmem:[#allocation2] sm:$0xff]  ;;  %s639_s30 = smov 96  }
  0x14   :  { %v67_v4 = vld [vmem:[#allocation6] sm:$0xff]  ;;  %300 = vrot.lane.b32.xlu0 %v679_v3, %s637_s2  ;;  %v686_v7 = vld [vmem:[#allocation2 + $0x8] sm:$0xff]  ;;  %325 = vrot.lane.b32.xlu1 %v681_v5, %s637_s2  ;;  %v711_v33 = vshrl.u32 %v240_v32, 7  ;;  %vm343_vm4 = vcmask 122880   ;;  %vm151_vm5 = vcmask 540168   ;;  %v184_v55 = vsel %vm71_vm0, %v683_v6, -inf }
  0x15   :  { %91 = vmatpush.msra.mxu0 %v69_v1  ;;  %505 = vmatpush.msra.mxu1 %v69_v1  ;;  %v693_v8 = vld [vmem:[#allocation6 + $0x24] ss:$0 sm:$0xff]  ;;  %v525_v20 = vld [vmem:[#allocation6 + $0x20] ss:$0 sm:$0xff]  ;;  %v526_v25 = vld [vmem:[#allocation6 + $0x21] ss:$0 sm:$0xff] }
  0x16   :  { %v242_v34 = vadd.s32 8, %v711_v33  ;;  %v247_v36 = vand.u32 7, %v711_v33  ;;  %vm279_vm1 = vcmp.lt.s32.totalorder %v711_v33, 1  ;;  %v191_v51 = vsel %vm71_vm0, %v686_v7, -inf  ;;  %s640_s7 = smov 127   ;;  %s239_s10 = sld [smem:[#allocation8]] }
  0x17   :  { %92 = vmatpush.msra.mxu0 %v68_v2  ;;  %506 = vmatpush.msra.mxu1 %v68_v2  ;;  %vm308_vm6 = vcmask 130048   ;;  %v192_v58 = vrot.slane %v191_v51, 4  ;;  %v185_v61 = vrot.slane %v184_v55, 4  ;;  %vm339_vm7 = vcmask 130055   ;;  %s774_s11 = sld [smem:[#allocation8 + $0x1]]  ;;  %s642_s12 = smov 64  }
  0x18   :  { %v254_v37 = vand.u32 7, %v242_v34  ;;  %vm716_vm2 = vcmp.ne.s32.totalorder %v247_v36, 0  ;;  %vm214_vm8 = vcmask 256000   ;;  %vm204_vm9 = vcmask 1041409   ;;  %s503_s13 = sld [smem:[#allocation8 + $0x2]]  ;;  %s644_s14 = smov [#allocation9]  }
  0x19   :  { %93 = vmatpush.msra.mxu0 %v67_v4  ;;  %507 = vmatpush.msra.mxu1 %v67_v4  ;;  %v193_v0 = vmax.f32 %v191_v51, %v192_v58  ;;  %v186_v2 = vmax.f32 %v184_v55, %v185_v61  ;;  %vm207_vm10 = vcmask 254976   ;;  %vm168_vm11 = vcmask 548368   ;;  %s486_s15 = sshll.u32 %s644_s14, 4  ;;  %s488_s18 = sshll.u32 %s791_s4, 4  ;;  %s487_s15 = int_to_ptr.vmem [resolvable:$true] %s486_s15  ;;  %s489_s18 = int_to_ptr.hbm [resolvable:$true] %s488_s18 }
  0x1a   :  { %500 = vmatmul.msk.f32.vlgmr.msra.gmra.mxu0 %vm71_vm0, %v683_v6  ;;  %501 = vmatmul.msk.f32.vlgmr.msra.gmra.mxu1 %vm71_vm0, %v686_v7  ;;  %vm720_vm3 = vcmp.ne.s32.totalorder %v254_v37, 0  ;;  %vm392_vm12 = vcmask 7168   ;;  %vm221_vm13 = vcmask 1042432   ;;  %vm479_vm14 = vcmask 8192  }
  0x1c   :  { %348 = vrot.lane.b32.xlu0 %v693_v8, %s637_s2 }
  0x86   :  { %v301_v9 = vpop.permute.xlu0 %300  ;;  %v326_v16 = vpop.permute.xlu1 %325 }
  0x8e   :  { %v349_v10 = vpop.permute.xlu0 %348 }
  0x97   :  { %v696_v11 = vpop.f32.mrf.mxu0  ;;  %v698_v12 = vpop.f32.mrf.mxu1 }
  0x98   :  { %290 = vrot.lane.b32.xlu0 %v698_v12, %s638_s3  ;;  %273 = vrot.lane.b32.xlu2 %v698_v12, %s639_s30  ;;  %v304_v13 = vadd.f32 %v301_v9, %v698_v12  ;;  %v303_v19 = vadd.f32 %v301_v9, %v696_v11  ;;  %v105_v22 = vadd.f32 %v525_v20, %v698_v12  ;;  %v152_v54 = vsel %vm151_vm5, %v696_v11, 0.0 }
  0x99   :  { %271 = vrot.lane.b32.xlu1 %v696_v11, %s639_s30  ;;  %v104_v24 = vadd.f32 %v525_v20, %v696_v11  ;;  %v153_v60 = vrot.slane %v152_v54, 4  ;;  %v159_v34 = vsel %vm151_vm5, %v698_v12, 0.0 }
  0x9a   :  { %v352_v14 = vmul.f32 %v349_v10, %v304_v13  ;;  %v329_v17 = vmul.f32 %v326_v16, %v304_v13  ;;  %v351_v21 = vmul.f32 %v349_v10, %v303_v19  ;;  %528 = vtanh.f32 %v105_v22 }
  0x9b   :  { %v328_v23 = vmul.f32 %v326_v16, %v303_v19  ;;  %530 = vtanh.f32 %v104_v24  ;;  %v154_v1 = vadd.f32 %v153_v60, %v152_v54  ;;  %v187_v10 = vrot.slane %v186_v2, 2  ;;  %v211_v19 = vld [vmem:[#allocation6 + $0x26] sm:$0x7] }
  0x9c   :  { %v355_v15 = vrot.slane %v352_v14, 7  ;;  %v332_v18 = vrot.slane %v329_v17, 7 }
  0x9d   :  { %v155_v9 = vrot.slane %v154_v1, 2  ;;  %v188_v16 = vmax.f32 %v186_v2, %v187_v10 }
  0xa0   :  { %358 = vrot.lane.b32.xlu0 %v355_v15, %s639_s30  ;;  %288 = vrot.lane.b32.xlu2 %v696_v11, %s638_s3  ;;  %v529_v26 = vpop.eup %528  ;;  %v156_v15 = vadd.f32 %v155_v9, %v154_v1 }
  0xa1   :  { %v110_v27 = vmul.f32 %v529_v26, %v526_v25  ;;  %v531_v28 = vpop.eup %530 }
  0xa2   :  { %v109_v30 = vmul.f32 %v531_v28, %v526_v25 }
  0xa3   :  { %v114_v29 = vsel %vm71_vm0, %v110_v27, 0.0 }
  0xa4   :  { %v111_v31 = vsel %vm71_vm0, %v109_v30, 0.0  ;;  %v527_v30 = vld [vmem:[#allocation6 + $0x25] ss:$0 sm:$0xff] }
  0xa8   :  { %335 = vrot.lane.b32.xlu0 %v332_v18, %s639_s30  ;;  %v66_v18 = vld [vmem:[%s788_s1 + $0x4] sm:$0x7] }
  0xa9   :  { %v213_v24 = vmul.f32 %v211_v19, %v66_v18 }
  0xab   :  { %v218_v27 = vsel %vm214_vm8, %v213_v24, 0.0 }
  0xb0   :  { %356 = vrot.lane.b32.xlu0 %v351_v21, %s639_s30 }
  0xb8   :  { %333 = vrot.lane.b32.xlu0 %v328_v23, %s639_s30  ;;  %v157_v23 = vrot.slane %v156_v15, 1 }
  0xba   :  { %v158_v26 = vadd.f32 %v157_v23, %v156_v15 }
  0xc3   :  { %115 = vadd.xlane.f32.xlu1 %v114_v29 }
  0xc9   :  { %112 = vadd.xlane.f32.xlu2 %v111_v31 }
  0xf2   :  { %v274_v35 = vpop.permute.xlu2 %273 }
  0xf3   :  { %v278_v40 = vrot.slane %v274_v35, 7 }
  0xfa   :  { %v289_v46 = vpop.permute.xlu2 %288 }
 0x10a   :  { %v291_v38 = vpop.permute.xlu0 %290 }
 0x10b   :  { %v272_v39 = vpop.permute.xlu1 %271 }
 0x10c   :  { %v277_v43 = vrot.slane %v272_v39, 7  ;;  %v160_v39 = vrot.slane %v159_v34, 4 }
 0x10e   :  { %v280_v44 = vsel %vm279_vm1, %v277_v43, %v278_v40  ;;  %v281_v45 = vsel %vm279_vm1, %v278_v40, %v277_v43  ;;  %v65_v43 = vld [vmem:[%s788_s1] sm:$0x7]  ;;  %s641_s1 = smov 126  }
 0x10f   :  { %v286_v47 = vsel %vm716_vm2, %v281_v45, 0.0  ;;  %v287_v48 = vsel %vm720_vm3, %v280_v44, 0.0  ;;  %v161_v45 = vadd.f32 %v160_v39, %v159_v34 }
 0x110   :  { %v294_v49 = vadd.f32 %v289_v46, %v286_v47  ;;  %v295_v50 = vadd.f32 %v291_v38, %v287_v48  ;;  %v212_v46 = vmul.f32 %v211_v19, %v65_v43 }
 0x112   :  { %v359_v52 = vpop.permute.xlu0 %358  ;;  %v297_v53 = vadd.f32 %v679_v3, %v294_v49  ;;  %v298_v57 = vadd.f32 %v679_v3, %v295_v50  ;;  %v194_v3 = vrot.slane %v193_v0, 2  ;;  %v162_v49 = vrot.slane %v161_v45, 2 }
 0x113   :  { %v365_v56 = vsel %vm343_vm4, %v359_v52, 0.0  ;;  %v215_v51 = vsel %vm214_vm8, %v212_v46, 0.0 }
 0x114   :  { %366 = vadd.xlane.f32.xlu1 %v365_v56  ;;  %v306_v59 = vmul.f32 %v681_v5, %v297_v53  ;;  %v317_v63 = vmul.f32 %v693_v8, %v298_v57  ;;  %v307_v13 = vmul.f32 %v681_v5, %v298_v57  ;;  %v195_v14 = vmax.f32 %v193_v0, %v194_v3 }
 0x115   :  { %v189_v5 = vrot.slane %v188_v16, 1  ;;  %v316_v38 = vmul.f32 %v693_v8, %v297_v53  ;;  %v163_v52 = vadd.f32 %v162_v49, %v161_v45 }
 0x116   :  { %v309_v62 = vsel %vm308_vm6, %v306_v59, 0.0  ;;  %v321_v6 = vsel %vm308_vm6, %v317_v63, 0.0  ;;  %v312_v21 = vsel %vm308_vm6, %v307_v13, 0.0  ;;  %v196_v22 = vrot.slane %v195_v14, 1 }
 0x117   :  { %310 = vadd.xlane.f32.xlu0 %v309_v62  ;;  %v190_v28 = vmax.f32 %v188_v16, %v189_v5  ;;  %v318_v44 = vsel %vm308_vm6, %v316_v38, 0.0  ;;  %v164_v58 = vrot.slane %v163_v52, 1 }
 0x118   :  { %v197_v25 = vmax.f32 %v195_v14, %v196_v22 }
 0x119   :  { %v199_v36 = vmul.f32 %v527_v30, %v190_v28  ;;  %v165_v0 = vadd.f32 %v164_v58, %v163_v52 }
 0x11a   :  { %v336_v4 = vpop.permute.xlu0 %335  ;;  %v200_v35 = vmul.f32 %v527_v30, %v197_v25 }
 0x11b   :  { %v344_v7 = vsel %vm343_vm4, %v336_v4, 0.0 }
 0x11c   :  { %322 = vadd.xlane.f32.xlu1 %v321_v6  ;;  %345 = vadd.xlane.f32.xlu2 %v344_v7  ;;  %v203_v37 = vrot.slane %v200_v35, 7 }
 0x11e   :  { %v205_v40 = vsel %vm204_vm9, %v203_v37, %v199_v36 }
 0x11f   :  { %v208_v61 = vsel %vm207_vm10, %v205_v40, 0.0 }
 0x122   :  { %v357_v17 = vpop.permute.xlu0 %356 }
 0x123   :  { %v362_v20 = vsel %vm339_vm7, %v357_v17, 0.0 }
 0x124   :  { %363 = vadd.xlane.f32.xlu1 %v362_v20  ;;  %313 = vadd.xlane.f32.xlu2 %v312_v21 }
 0x12a   :  { %v334_v29 = vpop.permute.xlu0 %333 }
 0x12b   :  { %422 = vrot.lane.b32.xlu0 %v158_v26, %s640_s7  ;;  %v340_v31 = vsel %vm339_vm7, %v334_v29, 0.0 }
 0x12c   :  { %219 = vadd.xlane.f32.xlu1 %v218_v27  ;;  %341 = vadd.xlane.f32.xlu2 %v340_v31 }
 0x134   :  { %319 = vadd.xlane.f32.xlu2 %v318_v44 }
 0x136   :  { %v116_v47 = vpop.xlane.xlu1 %115 }
 0x137   :  { %v123_v48 = vrot.slane %v116_v47, 4 }
 0x139   :  { %v124_v50 = vmax.f32 %v116_v47, %v123_v48 }
 0x13b   :  { %v125_v8 = vrot.slane %v124_v50, 2 }
 0x13c   :  { %v113_v53 = vpop.xlane.xlu2 %112  ;;  %216 = vadd.xlane.f32.xlu2 %v215_v51 }
 0x13d   :  { %v126_v54 = vmax.f32 %v124_v50, %v125_v8  ;;  %v117_v55 = vrot.slane %v113_v53, 4 }
 0x13f   :  { %v127_v56 = vrot.slane %v126_v54, 1  ;;  %v118_v57 = vmax.f32 %v113_v53, %v117_v55 }
 0x141   :  { %v128_v59 = vmax.f32 %v126_v54, %v127_v56  ;;  %v119_v60 = vrot.slane %v118_v57, 2  ;;  %v376_v56 = vstv %s239_s10 }
 0x143   :  { %v130_v62 = vsub.f32 %v116_v47, %v128_v59  ;;  %v120_v63 = vmax.f32 %v118_v57, %v119_v60 }
 0x144   :  { %209 = vadd.xlane.f32.xlu2 %v208_v61 }
 0x145   :  { %v133_v1 = vmul.f32 1.442695, %v130_v62  ;;  %v121_v2 = vrot.slane %v120_v63, 1  ;;  %424 = vrot.lane.b32.xlu1 %v165_v0, %s640_s7 }
 0x147   :  { %532 = vpow2.f32 %v133_v1  ;;  %v122_v4 = vmax.f32 %v120_v63, %v121_v2 }
 0x149   :  { %v129_v6 = vsub.f32 %v113_v53, %v122_v4 }
 0x14b   :  { %v131_v7 = vmul.f32 1.442695, %v129_v6 }
 0x14d   :  { %v533_v3 = vpop.eup %532  ;;  %534 = vpow2.f32 %v131_v7 }
 0x14e   :  { %v141_v9 = vrot.slane %v533_v3, 4 }
 0x150   :  { %v142_v10 = vadd.f32 %v533_v3, %v141_v9 }
 0x152   :  { %v143_v13 = vrot.slane %v142_v10, 2 }
 0x153   :  { %v535_v14 = vpop.eup %534 }
 0x154   :  { %v144_v15 = vadd.f32 %v143_v13, %v142_v10  ;;  %v135_v16 = vrot.slane %v535_v14, 4 }
 0x156   :  { %v136_v17 = vadd.f32 %v535_v14, %v135_v16  ;;  %v145_v18 = vrot.slane %v144_v15, 1 }
 0x158   :  { %v137_v19 = vrot.slane %v136_v17, 2  ;;  %v146_v20 = vadd.f32 %v145_v18, %v144_v15 }
 0x15a   :  { %v138_v21 = vadd.f32 %v137_v19, %v136_v17  ;;  %536 = vrcp.f32 %v146_v20 }
 0x15c   :  { %v139_v22 = vrot.slane %v138_v21, 1 }
 0x15e   :  { %v140_v23 = vadd.f32 %v139_v22, %v138_v21  ;;  %v449_v21 = vstv %s774_s11 }
 0x160   :  { %v537_v24 = vpop.eup %536  ;;  %538 = vrcp.f32 %v140_v23 }
 0x161   :  { %v150_v5 = vmul.f32 %v537_v24, %v533_v3 }
 0x163   :  { %v167_v25 = vmul.f32 %v150_v5, %v698_v12 }
 0x165   :  { %v176_v26 = vsel %vm168_vm11, %v167_v25, 0.0 }
 0x166   :  { %v539_v27 = vpop.eup %538  ;;  %v177_v28 = vrot.slane %v176_v26, 4 }
 0x167   :  { %v149_v29 = vmul.f32 %v539_v27, %v535_v14 }
 0x168   :  { %v178_v30 = vadd.f32 %v177_v28, %v176_v26 }
 0x169   :  { %v166_v31 = vmul.f32 %v149_v29, %v696_v11 }
 0x16a   :  { %v179_v34 = vrot.slane %v178_v30, 2 }
 0x16b   :  { %v169_v35 = vsel %vm168_vm11, %v166_v31, 0.0 }
 0x16c   :  { %v180_v36 = vadd.f32 %v179_v34, %v178_v30  ;;  %v170_v37 = vrot.slane %v169_v35, 4 }
 0x16e   :  { %v181_v38 = vrot.slane %v180_v36, 1  ;;  %v171_v39 = vadd.f32 %v170_v37, %v169_v35 }
 0x170   :  { %v182_v40 = vadd.f32 %v181_v38, %v180_v36  ;;  %v172_v43 = vrot.slane %v171_v39, 2 }
 0x172   :  { %434 = vrot.lane.b32.xlu2 %v182_v40, %s641_s1  ;;  %v173_v44 = vadd.f32 %v172_v43, %v171_v39 }
 0x174   :  { %v174_v45 = vrot.slane %v173_v44, 1 }
 0x176   :  { %v175_v46 = vadd.f32 %v174_v45, %v173_v44 }
 0x178   :  { %432 = vrot.lane.b32.xlu1 %v175_v46, %s641_s1 }
 0x187   :  { %v367_v48 = vpop.xlane.xlu1 %366 }
 0x188   :  { %v381_v58 = vrot.slane %v367_v48, 1  ;;  %v643_v48 = vmov 64  }
 0x189   :  { %521 = vset.pattern.permute.xlu0 %v643_v48 }
 0x18a   :  { %v311_v49 = vpop.xlane.xlu0 %310 }
 0x18b   :  { %v368_v51 = vrot.slane %v311_v49, 7 }
 0x18f   :  { %v346_v47 = vpop.xlane.xlu2 %345  ;;  %v323_v53 = vpop.xlane.xlu1 %322 }
 0x190   :  { %v389_v63 = vadd.f32 %v376_v56, %v346_v47 }
 0x192   :  { %v410_v42 = vmax.f32 %v389_v63, 0.0 }
 0x194   :  { %v413_v15 = vrot.slane %v410_v42, 1 }
 0x197   :  { %v314_v50 = vpop.xlane.xlu2 %313  ;;  %v364_v17 = vpop.xlane.xlu1 %363 }
 0x198   :  { %v369_v8 = vrot.slane %v314_v50, 7  ;;  %v385_v61 = vadd.f32 %v381_v58, %v314_v50  ;;  %v384_v22 = vadd.f32 %v364_v17, %v311_v49 }
 0x19a   :  { %v370_v52 = vsel %vm279_vm1, %v368_v51, %v369_v8  ;;  %v371_v1 = vsel %vm279_vm1, %v369_v8, %v368_v51  ;;  %v387_v2 = vadd.f32 %v385_v61, %v376_v56  ;;  %v386_v26 = vadd.f32 %v384_v22, %v376_v56 }
 0x19b   :  { %v373_v54 = vsel %vm720_vm3, %v370_v52, 0.0  ;;  %v372_v6 = vsel %vm716_vm2, %v371_v1, 0.0 }
 0x19c   :  { %v375_v55 = vadd.f32 %v373_v54, %v323_v53  ;;  %v408_v10 = vmax.f32 %v387_v2, 0.0  ;;  %v407_v31 = vmax.f32 %v386_v26, 0.0 }
 0x19e   :  { %v378_v57 = vadd.f32 %v376_v56, %v375_v55  ;;  %v417_v18 = vmax.f32 %v408_v10, %v413_v15 }
 0x19f   :  { %v342_v59 = vpop.xlane.xlu2 %341  ;;  %v220_v43 = vpop.xlane.xlu1 %219 }
 0x1a0   :  { %v391_v60 = vmax.f32 %v378_v57, 0.0  ;;  %v388_v41 = vadd.f32 %v376_v56, %v342_v59  ;;  %v229_v44 = vsel %vm221_vm13, %v220_v43, 0.0  ;;  %v423_v57 = vpop.permute.xlu0 %422 }
 0x1a1   :  { %v230_v45 = vrot.slane %v229_v44, 4  ;;  %v428_v63 = vadd.f32 %v423_v57, %v696_v11  ;;  %v476_v11 = vand.u32 127, %v240_v32 }
 0x1a2   :  { %v400_v62 = vsel %vm392_vm12, %v391_v60, -inf  ;;  %v409_v29 = vmax.f32 %v388_v41, 0.0 }
 0x1a3   :  { %v401_v0 = vrot.slane %v400_v62, 4  ;;  %v231_v49 = vadd.f32 %v230_v45, %v229_v44 }
 0x1a4   :  { %v416_v35 = vmax.f32 %v407_v31, %v409_v29 }
 0x1a5   :  { %v402_v4 = vmax.f32 %v400_v62, %v401_v0  ;;  %v232_v51 = vrot.slane %v231_v49, 2 }
 0x1a7   :  { %v403_v7 = vrot.slane %v402_v4, 2  ;;  %v320_v3 = vpop.xlane.xlu2 %319  ;;  %v233_v53 = vadd.f32 %v232_v51, %v231_v49 }
 0x1a8   :  { %v374_v9 = vadd.f32 %v372_v6, %v320_v3 }
 0x1a9   :  { %v404_v13 = vmax.f32 %v402_v4, %v403_v7  ;;  %v234_v58 = vrot.slane %v233_v53, 1 }
 0x1aa   :  { %v377_v14 = vadd.f32 %v376_v56, %v374_v9 }
 0x1ab   :  { %v405_v16 = vrot.slane %v404_v13, 1  ;;  %v235_v1 = vadd.f32 %v234_v58, %v233_v53 }
 0x1ac   :  { %v390_v33 = vmax.f32 %v377_v14, 0.0 }
 0x1ad   :  { %v406_v19 = vmax.f32 %v404_v13, %v405_v16 }
 0x1ae   :  { %v393_v20 = vsel %vm392_vm12, %v390_v33, -inf }
 0x1af   :  { %v394_v23 = vrot.slane %v393_v20, 4  ;;  %v419_v24 = vmax.f32 %v406_v19, %v417_v18  ;;  %v217_v40 = vpop.xlane.xlu2 %216 }
 0x1b0   :  { %v222_v46 = vsel %vm221_vm13, %v217_v40, 0.0 }
 0x1b1   :  { %v395_v5 = vmax.f32 %v393_v20, %v394_v23  ;;  %v451_v25 = vmul.f32 %v449_v21, %v419_v24  ;;  %v223_v50 = vrot.slane %v222_v46, 4 }
 0x1b3   :  { %v396_v27 = vrot.slane %v395_v5, 2  ;;  %v455_v28 = vrot.slane %v451_v25, 7  ;;  %v224_v8 = vadd.f32 %v223_v50, %v222_v46 }
 0x1b5   :  { %v397_v30 = vmax.f32 %v395_v5, %v396_v27  ;;  %458 = vrot.lane.b32.xlu0 %v455_v28, %s642_s12  ;;  %v225_v56 = vrot.slane %v224_v8, 2 }
 0x1b7   :  { %v398_v34 = vrot.slane %v397_v30, 1  ;;  %v210_v47 = vpop.xlane.xlu2 %209  ;;  %v425_v52 = vpop.permute.xlu1 %424  ;;  %v226_v61 = vadd.f32 %v225_v56, %v224_v8 }
 0x1b8   :  { %v429_v55 = vadd.f32 %v425_v52, %v698_v12  ;;  %v441_v59 = vrot.slane %v210_v47, 1  ;;  %v465_v12 = vstv %s503_s13 }
 0x1b9   :  { %v399_v36 = vmax.f32 %v397_v30, %v398_v34  ;;  %v227_v2 = vrot.slane %v226_v61, 1 }
 0x1bb   :  { %v418_v37 = vmax.f32 %v399_v36, %v416_v35  ;;  %v228_v9 = vadd.f32 %v227_v2, %v226_v61 }
 0x1bd   :  { %v450_v38 = vmul.f32 %v449_v21, %v418_v37 }
 0x1bf   :  { %v454_v39 = vrot.slane %v450_v38, 7 }
 0x1c1   :  { %456 = vrot.lane.b32.xlu1 %v454_v39, %s642_s12 }
 0x1cc   :  { %v435_v54 = vpop.permute.xlu2 %434 }
 0x1cd   :  { %v439_v60 = vadd.f32 %v435_v54, %v429_v55 }
 0x1cf   :  { %v445_v0 = vadd.f32 %v441_v59, %v439_v60 }
 0x1d1   :  { %v447_v6 = vadd.f32 %v445_v0, %v235_v1 }
 0x1ea   :  { %v433_v62 = vpop.permute.xlu1 %432 }
 0x1eb   :  { %v438_v4 = vadd.f32 %v433_v62, %v428_v63 }
 0x1ed   :  { %v444_v7 = vadd.f32 %v438_v4, %v210_v47 }
 0x1ef   :  { %v446_v13 = vadd.f32 %v444_v7, %v228_v9 }
 0x227   :  { %v459_v42 = vpop.permute.xlu0 %458 }
 0x228   :  { %v463_v3 = vadd.f32 %v459_v42, %v447_v6 }
 0x22a   :  { %v467_v10 = vadd.f32 %v465_v12, %v463_v3 }
 0x22c   :  { %v470_v16 = vrot.slane %v467_v10, 7 }
 0x233   :  { %v457_v14 = vpop.permute.xlu1 %456 }
 0x234   :  { %v462_v15 = vadd.f32 %v457_v14, %v446_v13 }
 0x236   :  { %v466_v17 = vadd.f32 %v465_v12, %v462_v15 }
 0x238   :  { %v471_v33 = vsel %vm204_vm9, %v470_v16, %v466_v17 }
 0x239   :  { %473 = vperm.xlu0 %521, %v471_v33  }
 0x2ab   :  { %v474_v18 = vpop.permute.xlu0 %473 }
 0x2ac   :  { %v477_v19 = vperm.slane %v474_v18, %v476_v11 }
 0x2ae   :  { %480 = vst.msk [vmem:[#allocation9] sm:$0x1] %vm479_vm14, %v477_v19 }
 0x2af   :  { %491 = dma.vmem_to_hbm [thread:$0]  %s487_s15, 16, %s489_s18, [#allocation4]  }
 0x2b0   :  { %630 = dma.done.wait [#allocation4], 16  }
 0x2b1   :  { %631 = vsyncadd [#allocation4], 4294967280 }
 0x2b2   :  { %496 = vsyncpa [#allocation3], 1 }
 0x2b3   :  { %497 = vsyncpa [#allocation7], 1 }
 0x2b4   :  { %498 = vsyncpa [#allocation4], 1 }
 0x2b5   :  { %499 = vsyncpa [#allocation5], 1 }

</bundles_post_ra>
